<compile_context>
chip_gen: v6e
topology: v6e:2x2x1
jax: 0.10.0
libtpu: 0.0.40
codegen_flags: <defaults>
</compile_context>

<pallas_src>
import jax
import jax.numpy as jnp
from jax.experimental import pallas as pl
from jax.experimental.pallas import tpu as pltpu

NUM_QUBITS = 4
NUM_CLASS = 2  # kept for parity with the PyTorch module's __init__ signature
BATCH = 2

_LANE = 128


# ----------------------------------------------------------------------------
# Pallas kernel: z_exp_all
# ----------------------------------------------------------------------------
def _z_exp_all_kernel(x_ref, w_ref, out_ref):
    # x: (2N, TR)  packed [real; imag] mode amplitudes, rows (b*N+j) on lanes
    # w: (2N, 1)   2*occ stacked twice along sublanes
    x = x_ref[...]
    w = w_ref[...]
    # |U|^2 weighted by 2*occ, reduced over the mode (sublane) axis -> (1, TR).
    out_ref[...] = 1.0 - jnp.sum(x * x * w, axis=0, keepdims=True)


def z_exp_all(u_real, u_imag, occ):
    """Compute <Z_j> for all qubits of a batched free-fermionic state."""
    B, N, _ = u_real.shape
    R = B * N

    # Lane tile: at least one full vreg width, capped so large problems tile.
    TR = max(_LANE, min(1024, pl.next_power_of_2(R)))
    R_pad = pl.cdiv(R, TR) * TR

    # Pack: mode k -> sublanes (real then imag), flattened (b, j) row -> lanes.
    ur = u_real.astype(jnp.float32).reshape(R, N).T          # (N, R)
    ui = u_imag.astype(jnp.float32).reshape(R, N).T          # (N, R)
    x = jnp.concatenate([ur, ui], axis=0)                    # (2N, R)
    x = jnp.pad(x, ((0, 0), (0, R_pad - R)))                 # (2N, R_pad)

    # Fold the "1 - 2*n_occ" scale into the occupation weights.
    occ_f = occ.astype(jnp.float32).reshape(N)
    w = (2.0 * jnp.concatenate([occ_f, occ_f])).reshape(2 * N, 1)  # (2N, 1)

    out = pl.pallas_call(
        _z_exp_all_kernel,
        out_shape=jax.ShapeDtypeStruct((1, R_pad), jnp.float32),
        grid=(R_pad // TR,),
        in_specs=[
            pl.BlockSpec((2 * N, TR), lambda i: (0, i)),
            pl.BlockSpec((2 * N, 1), lambda i: (0, 0)),
        ],
        out_specs=pl.BlockSpec((1, TR), lambda i: (0, i)),
        compiler_params=pltpu.CompilerParams(
            dimension_semantics=("parallel",)),
    )(x, w)

    # Strip lane padding and restore the (batch, qubit) view.
    return out[0, :R].reshape(B, N)


# ----------------------------------------------------------------------------
# Minimal FFQuantumDevice stand-in + Measure module
# ----------------------------------------------------------------------------
# TODO(synk): the original FFQuantumDevice class is not provided; we model its
# state as a batched complex mode matrix + occupation vector (standard
# free-fermion representation) and implement z_exp_all() on that state.
class FFQuantumDevice:
    def __init__(self, u_real, u_imag, occ):
        self.u_real = u_real
        self.u_imag = u_imag
        self.occ = occ

    def z_exp_all(self):
        return z_exp_all(self.u_real, self.u_imag, self.occ)


class Measure:
    """JAX/Pallas equivalent of the PyTorch Measure module."""

    def __init__(self, num_qubits, num_class):
        self.num_qubits = num_qubits
        self.num_class = num_class

    def __call__(self, circuit: FFQuantumDevice):
        return circuit.z_exp_all()


# ----------------------------------------------------------------------------
# Demo / correctness check
# ----------------------------------------------------------------------------
def _reference_z_exp_all(u_real, u_imag, occ):
    prob = u_real * u_real + u_imag * u_imag
    n_occ = jnp.sum(prob * occ[None, None, :], axis=-1)
    return 1.0 - 2.0 * n_occ


if __name__ == "__main__":
    key = jax.random.PRNGKey(0)
    k_r, k_i = jax.random.split(key)

    # Deterministic synthetic free-fermionic state: complex Gaussian rows,
    # row-normalized so that sum_k |U[b,j,k]|^2 == 1  (=> <Z_j> in [-1, 1]).
    u_real = jax.random.normal(k_r, (BATCH, NUM_QUBITS, NUM_QUBITS), jnp.float32)
    u_imag = jax.random.normal(k_i, (BATCH, NUM_QUBITS, NUM_QUBITS), jnp.float32)
    norm = jnp.sqrt(jnp.sum(u_real**2 + u_imag**2, axis=-1, keepdims=True))
    u_real = u_real / norm
    u_imag = u_imag / norm

    # Deterministic half-filling occupation pattern (entries in {0,1}; padded
    # lanes introduced by the wrapper carry zero weight, so padding is safe).
    occ = jnp.array([1.0, 0.0, 1.0, 0.0], dtype=jnp.float32)

    circuit = FFQuantumDevice(u_real, u_imag, occ)
    measure = Measure(NUM_QUBITS, NUM_CLASS)

    meas = measure(circuit)
    meas = jax.block_until_ready(meas)

    ref = _reference_z_exp_all(u_real, u_imag, occ)
    assert meas.shape == (BATCH, NUM_QUBITS)
    assert jnp.allclose(meas, ref, atol=1e-5, rtol=1e-5)

    print("KERNEL_OK")
</pallas_src>

<mosaic_0001>
module attributes {stable_mosaic.version = 11 : i64} {
  func.func @_z_exp_all_kernel(%arg0: i32, %arg1: memref<8x128xf32, #tpu.memory_space<vmem>>, %arg2: memref<8x1xf32, #tpu.memory_space<vmem>>, %arg3: memref<1x128xf32, #tpu.memory_space<vmem>>) attributes {dimension_semantics = [#tpu.dimension_semantics<parallel>], iteration_bounds = array<i64: 1>, scalar_prefetch = 0 : i64, scratch_operands = 0 : i64, tpu.core_type = #tpu.core_type<tc>, window_params = [{transform_indices = @transform_0, window_bounds = array<i64: 8, 128>}, {pipeline_mode = #tpu.pipeline_mode<synchronous>, transform_indices = @transform_1, window_bounds = array<i64: 8, 1>}, {transform_indices = @transform_2, window_bounds = array<i64: 1, 128>}]} {
    %c0 = arith.constant 0 : index
    %c0_0 = arith.constant 0 : index
    %0 = vector.load %arg1[%c0, %c0_0] : memref<8x128xf32, #tpu.memory_space<vmem>>, vector<8x128xf32>
    %c0_1 = arith.constant 0 : index
    %c0_2 = arith.constant 0 : index
    %1 = vector.load %arg2[%c0_1, %c0_2] : memref<8x1xf32, #tpu.memory_space<vmem>>, vector<8x1xf32>
    %2 = arith.mulf %0, %0 : vector<8x128xf32>
    %3 = vector.broadcast %1 : vector<8x1xf32> to vector<8x128xf32>
    %4 = arith.mulf %2, %3 : vector<8x128xf32>
    %cst = arith.constant dense<0.000000e+00> : vector<128xf32>
    %5 = vector.multi_reduction <add>, %4, %cst [0] : vector<8x128xf32> to vector<128xf32>
    %6 = vector.shape_cast %5 : vector<128xf32> to vector<1x128xf32>
    %cst_3 = arith.constant 1.000000e+00 : f32
    %7 = vector.broadcast %cst_3 : f32 to vector<1x128xf32>
    %8 = arith.subf %7, %6 : vector<1x128xf32>
    %c0_4 = arith.constant 0 : index
    %c0_5 = arith.constant 0 : index
    %9 = vector.load %arg3[%c0_4, %c0_5] : memref<1x128xf32, #tpu.memory_space<vmem>>, vector<1x128xf32>
    tpu.vector_store %arg3[%c0_4, %c0_5], %8 {strides = array<i32>} : memref<1x128xf32, #tpu.memory_space<vmem>>, vector<1x128xf32>,
    return
  }
  func.func @transform_0(%arg0: i32) -> (i32, i32) {
    %c0_i32 = arith.constant 0 : i32
    %c0_i32_0 = arith.constant 0 : i32
    return %c0_i32, %arg0 : i32, i32
  }
  func.func @transform_1(%arg0: i32) -> (i32, i32) {
    %c0_i32 = arith.constant 0 : i32
    %c0_i32_0 = arith.constant 0 : i32
    %c0_i32_1 = arith.constant 0 : i32
    return %c0_i32, %c0_i32_0 : i32, i32
  }
  func.func @transform_2(%arg0: i32) -> (i32, i32) {
    %c0_i32 = arith.constant 0 : i32
    %c0_i32_0 = arith.constant 0 : i32
    return %c0_i32, %arg0 : i32, i32
  }
}

</mosaic_0001>

<bundles_post_ra>
// kernel: tpu_custom_call.1
= control target key start
LH: loop header
LB: loop body
LE: loop exit
PB: predicated region body
PF: predicated region fallthrough
CT: control target
= control target key end

     0   :  { %s94_s0 = inlined_call_operand.vmem [shape: f32[8,128], index: 0, kind: input, shape index: {}]   ;;  %s95_s1 = inlined_call_operand.vmem [shape: f32[8,1], index: 1, kind: input, shape index: {}]   ;;  %s96_s2 = inlined_call_operand.hbm [shape: f32[1,128], index: 2, kind: output, shape index: {}]  }
   0x1   :  { %v13_v0 = vld [vmem:[%s95_s1] sm:$0xff] }
   0x2   :  { %7 = vsyncpa [#allocation3], 0  ;;  %v68_v1 = vmov 0   ;;  %v12_v2 = vld [vmem:[%s94_s0] sm:$0xff]  ;;  %s69_s13 = smov [#allocation2]  }
   0x3   :  { %45 = vset.pattern.permute.xlu0 %v68_v1  ;;  %v14_v3 = vmul.f32 %v12_v2, %v12_v2  ;;  %s35_s14 = sshll.u32 %s69_s13, 4  ;;  %s36_s14 = int_to_ptr.vmem [resolvable:$true] %s35_s14 }
   0x4   :  { %17 = vperm.xlu0 %45, %v13_v0   ;;  %s46_s1 = scalar_lea.vmem %s36_s14, 16  ;;  %s50_s15 = scalar_lea.vmem %s36_s14, 32 }
   0x5   :  { %p47_p0 = scmp.ne.s32.totalorder %s36_s14, %s46_s1  ;;  %p51_p1 = scmp.lt.s32.totalorder %s36_s14, %s36_s14 }
   0x6   :  { %p52_p2 = scmp.lt.s32.totalorder %s50_s15, %s46_s1 }
   0x8   :  { %p53_p3 = por %p52_p2, %p51_p1 }
   0xa   :  { %p54_p4 = pnand %p53_p3, %p47_p0 }
  0x7f   :  { %v18_v4 = vpop.permute.xlu0 %17 }
  0x80   :  { %v20_v5 = vmul.f32 %v18_v4, %v14_v3 }
  0x82   :  { %v21_v6 = vrot.slane %v20_v5, 4 }
  0x84   :  { %v22_v7 = vadd.f32 %v21_v6, %v20_v5 }
  0x86   :  { %v23_v8 = vrot.slane %v22_v7, 2 }
  0x88   :  { %v24_v9 = vadd.f32 %v23_v8, %v22_v7 }
  0x8a   :  { %v25_v10 = vrot.slane %v24_v9, 1 }
  0x8c   :  { %v26_v11 = vadd.f32 %v25_v10, %v24_v9 }
  0x8e   :  { %v27_v12 = vsub.f32 1.0, %v26_v11 }
  0x90   :  { %28 = vst [vmem:[#allocation2] sm:$0x1] %v27_v12 }
  0x91   :  { %57 = shalt.err (!%p54_p4)
}
  0x92   :  { %38 = dma.vmem_to_hbm [thread:$0]  %s36_s14, 16, %s96_s2, [#allocation3]  }
  0x93   :  { %66 = dma.done.wait [#allocation3], 16  }
  0x94   :  { %67 = vsyncadd [#allocation3], 4294967280 }
  0x95   :  { %42 = vsyncpa [#allocation3], 1 }

</bundles_post_ra>
